<compile_context>
chip_gen: v6e
topology: v6e:2x2x1
jax: 0.10.0
libtpu: 0.0.40
codegen_flags: <defaults>
</compile_context>

<pallas_src>
import functools

import numpy as np
import jax
import jax.numpy as jnp
from jax.experimental import pallas as pl
from jax.experimental.pallas import tpu as pltpu

EPS = 1e-5


# ----------------------------- kernel -----------------------------

def _mm(a, w):
    """MXU matmul: cast activations to the weights' dtype, accumulate in f32."""
    return jnp.dot(a.astype(w.dtype), w, preferred_element_type=jnp.float32)


def autoencoder_kernel(x_ref, ew1_ref, ew2_ref, pw1_ref, pw2_ref, vec_ref,
                       p_ref, z_ref):
    """One view (B rows) per grid step: encoder + batch_norm2 + predictor."""
    HEp = ew1_ref.shape[1]          # padded encoder hidden width
    Lp = ew2_ref.shape[1]           # padded latent width
    HPp = pw1_ref.shape[1]          # padded predictor hidden width

    # Packed per-feature vectors (one DMA; padded lanes are zero, which keeps
    # padded columns exactly zero through BatchNorm and subsequent matmuls).
    vecs = vec_ref[...]
    bn1_g = vecs[0:1, :HEp]
    bn1_b = vecs[1:2, :HEp]
    bn2_g = vecs[2:3, :Lp]
    bn2_b = vecs[3:4, :Lp]
    pb1 = vecs[4:5, :HPp]
    pb2 = vecs[5:6, :Lp]

    def bn(h, gamma, beta):
        # Training-mode BatchNorm1d over this view's batch axis (biased var).
        # var = E[h^2] - E[h]^2 -> the two reductions are independent.
        mean = jnp.mean(h, axis=0, keepdims=True)
        meansq = jnp.mean(h * h, axis=0, keepdims=True)
        var = meansq - mean * mean
        return (h - mean) * jax.lax.rsqrt(var + EPS) * gamma + beta

    x = x_ref[...]

    # --- encoder ---
    # Linear1 (bias eb1 dropped: cancelled by BatchNorm's mean subtraction)
    h = _mm(x, ew1_ref[...])
    # Dropout(0.2) -> identity ; BatchNorm1d ; ReLU ; Dropout(0.2) -> identity
    h = jnp.maximum(bn(h, bn1_g, bn1_b), 0.0)
    # Linear2 (bias eb2 dropped: cancelled by batch_norm2)
    z = bn(_mm(h, ew2_ref[...]), bn2_g, bn2_b)          # self.batch_norm2
    z_ref[...] = z

    # --- predictor ---
    hp = jnp.maximum(_mm(z, pw1_ref[...]) + pb1, 0.0)   # Linear + (Dropout=id) + ReLU
    p_ref[...] = _mm(hp, pw2_ref[...]) + pb2            # (Dropout=id) + Linear


# ----------------------------- wrapper -----------------------------

def _rup(n, m=128):
    return ((n + m - 1) // m) * m


def _pad2(a, shape):
    return jnp.pad(a, [(0, t - s) for s, t in zip(a.shape, shape)])


@functools.lru_cache(maxsize=None)
def _vmem_limit_bytes():
    """Size the scoped-VMEM budget per generation (~3/4 of physical VMEM)."""
    cap = 64 * 1024 * 1024
    try:
        info = pltpu.get_tpu_info()
        cap = int(getattr(info, "vmem_capacity_bytes", cap) or cap)
    except Exception:
        pass
    return (cap * 3) // 4          # v5e/v6e -> ~96 MiB, v7x -> ~48 MiB


def prepare_params(params, matmul_dtype=jnp.bfloat16):
    """One-time padding / packing / casting of parameters into kernel layout.

    Done once at init so the per-call wrapper only pads the activations.
    """
    IN, HE = params["ew1"].shape
    L = params["ew2"].shape[1]
    HP = params["pw1"].shape[1]
    INp, HEp, Lp, HPp = _rup(IN), _rup(HE), _rup(L), _rup(HP)
    FMAX = max(HEp, Lp, HPp)
    f32 = jnp.float32

    ew1 = _pad2(params["ew1"], (INp, HEp)).astype(matmul_dtype)
    ew2 = _pad2(params["ew2"], (HEp, Lp)).astype(matmul_dtype)
    pw1 = _pad2(params["pw1"], (Lp, HPp)).astype(matmul_dtype)
    pw2 = _pad2(params["pw2"], (HPp, Lp)).astype(matmul_dtype)
    # NOTE: eb1 / eb2 intentionally not packed — exactly cancelled by the
    # batch-stats BatchNorms that follow them.

    vecs = jnp.zeros((8, FMAX), f32)
    vecs = vecs.at[0, :HE].set(params["bn1_g"][0])
    vecs = vecs.at[1, :HE].set(params["bn1_b"][0])
    vecs = vecs.at[2, :L].set(params["bn2_g"][0])
    vecs = vecs.at[3, :L].set(params["bn2_b"][0])
    vecs = vecs.at[4, :HP].set(params["pb1"][0])
    vecs = vecs.at[5, :L].set(params["pb2"][0])

    return dict(ew1=ew1, ew2=ew2, pw1=pw1, pw2=pw2, vecs=vecs)


@functools.partial(jax.jit, static_argnames=("latent_dim",))
def autoencoder_forward(x1, x2, prep, *, latent_dim):
    B, IN = x1.shape
    assert B % 8 == 0, "batch must be a multiple of 8 sublanes"
    ew1, ew2, pw1, pw2, vecs = (prep["ew1"], prep["ew2"], prep["pw1"],
                                prep["pw2"], prep["vecs"])
    INp, HEp = ew1.shape
    Lp, HPp = pw1.shape
    FMAX = vecs.shape[1]
    f32 = jnp.float32

    # Per-call work is only the activation pad (fuses under jit).
    # Rows [0:B) = view 1, rows [B:2B) = view 2.
    X = jnp.zeros((2 * B, INp), f32).at[:B, :IN].set(x1).at[B:, :IN].set(x2)

    p_all, z_all = pl.pallas_call(
        autoencoder_kernel,
        out_shape=(
            jax.ShapeDtypeStruct((2 * B, Lp), f32),   # stacked [p1; p2]
            jax.ShapeDtypeStruct((2 * B, Lp), f32),   # stacked [z1; z2]
        ),
        grid=(2,),                                    # one view per grid step
        in_specs=[
            pl.BlockSpec((B, INp), lambda v: (v, 0)),      # this view's rows
            pl.BlockSpec((INp, HEp), lambda v: (0, 0)),    # weights: constant
            pl.BlockSpec((HEp, Lp), lambda v: (0, 0)),     #  index_maps ->
            pl.BlockSpec((Lp, HPp), lambda v: (0, 0)),     #  VMEM-resident
            pl.BlockSpec((HPp, Lp), lambda v: (0, 0)),
            pl.BlockSpec((8, FMAX), lambda v: (0, 0)),     # packed vectors
        ],
        out_specs=(
            pl.BlockSpec((B, Lp), lambda v: (v, 0)),
            pl.BlockSpec((B, Lp), lambda v: (v, 0)),
        ),
        compiler_params=pltpu.CompilerParams(
            dimension_semantics=("parallel",),        # views -> 2 TCs on v7x
            vmem_limit_bytes=_vmem_limit_bytes(),
        ),
    )(X, ew1, ew2, pw1, pw2, vecs)

    L = latent_dim
    return p_all[:B, :L], p_all[B:, :L], z_all[:B, :L], z_all[B:, :L]


# ----------------------------- parameter setup -----------------------------

def linear_params(key, fan_in, fan_out):
    """PyTorch-style uniform(-1/sqrt(fan_in), 1/sqrt(fan_in)) init, (in,out) layout."""
    kw, kb = jax.random.split(key)
    bound = 1.0 / np.sqrt(fan_in)
    w = jax.random.uniform(kw, (fan_in, fan_out), jnp.float32, -bound, bound)
    b = jax.random.uniform(kb, (1, fan_out), jnp.float32, -bound, bound)
    return w, b


def init_params(key, input_dim, latent_dim):
    k1, k2, k3, k4 = jax.random.split(key, 4)
    hid_e = input_dim * 5
    hid_p = latent_dim * 5
    ew1, eb1 = linear_params(k1, input_dim, hid_e)
    ew2, eb2 = linear_params(k2, hid_e, latent_dim)
    pw1, pb1 = linear_params(k3, latent_dim, hid_p)
    pw2, pb2 = linear_params(k4, hid_p, latent_dim)
    return dict(
        ew1=ew1, eb1=eb1,
        bn1_g=jnp.ones((1, hid_e), jnp.float32), bn1_b=jnp.zeros((1, hid_e), jnp.float32),
        ew2=ew2, eb2=eb2,
        bn2_g=jnp.ones((1, latent_dim), jnp.float32), bn2_b=jnp.zeros((1, latent_dim), jnp.float32),
        pw1=pw1, pb1=pb1, pw2=pw2, pb2=pb2,
    )


# ----------------------------- plain-JAX reference -----------------------------

def reference_forward(x1, x2, p, matmul_dtype=jnp.float32):
    """Exact module semantics (with biases); optional bf16 matmul operands."""
    def mm(a, w):
        return jnp.dot(a.astype(matmul_dtype), w.astype(matmul_dtype),
                       preferred_element_type=jnp.float32)

    def bn(h, g, b):
        m = jnp.mean(h, axis=0, keepdims=True)
        v = jnp.mean((h - m) ** 2, axis=0, keepdims=True)
        return (h - m) * jax.lax.rsqrt(v + EPS) * g + b

    def enc(x):
        h = mm(x, p["ew1"]) + p["eb1"]
        h = jnp.maximum(bn(h, p["bn1_g"], p["bn1_b"]), 0.0)
        z = mm(h, p["ew2"]) + p["eb2"]
        return bn(z, p["bn2_g"], p["bn2_b"])

    def pred(z):
        h = jnp.maximum(mm(z, p["pw1"]) + p["pb1"], 0.0)
        return mm(h, p["pw2"]) + p["pb2"]

    z1, z2 = enc(x1), enc(x2)
    return pred(z1), pred(z2), z1, z2


if __name__ == "__main__":
    B, INPUT_DIM, LATENT_DIM = 8, 16, 8

    key = jax.random.PRNGKey(0)
    kx1, kx2, kp = jax.random.split(key, 3)
    x1 = jax.random.normal(kx1, (B, INPUT_DIM), jnp.float32)
    x2 = jax.random.normal(kx2, (B, INPUT_DIM), jnp.float32)
    params = init_params(kp, INPUT_DIM, LATENT_DIM)

    # Default perf path: bf16 matmul operands, f32 accumulation & BN math.
    prep_bf16 = prepare_params(params, matmul_dtype=jnp.bfloat16)
    out_bf16 = jax.block_until_ready(
        autoencoder_forward(x1, x2, prep_bf16, latent_dim=LATENT_DIM))
    ref_bf16 = reference_forward(x1, x2, params, matmul_dtype=jnp.bfloat16)
    for got, want in zip(out_bf16, ref_bf16):
        np.testing.assert_allclose(np.asarray(got), np.asarray(want),
                                   rtol=5e-3, atol=5e-3)

    # Exact-semantics check: f32 matmuls vs the f32 module reference.
    prep_f32 = prepare_params(params, matmul_dtype=jnp.float32)
    out_f32 = jax.block_until_ready(
        autoencoder_forward(x1, x2, prep_f32, latent_dim=LATENT_DIM))
    ref_f32 = reference_forward(x1, x2, params, matmul_dtype=jnp.float32)
    for got, want in zip(out_f32, ref_f32):
        np.testing.assert_allclose(np.asarray(got), np.asarray(want),
                                   rtol=1e-5, atol=1e-5)

    print("KERNEL_OK")
</pallas_src>

<mosaic_0001>
module attributes {stable_mosaic.version = 11 : i64} {
  func.func @autoencoder_kernel(%arg0: i32, %arg1: memref<8x128xf32, #tpu.memory_space<vmem>>, %arg2: memref<128x128xbf16, #tpu.memory_space<vmem>>, %arg3: memref<128x128xbf16, #tpu.memory_space<vmem>>, %arg4: memref<128x128xbf16, #tpu.memory_space<vmem>>, %arg5: memref<128x128xbf16, #tpu.memory_space<vmem>>, %arg6: memref<8x128xf32, #tpu.memory_space<vmem>>, %arg7: memref<8x128xf32, #tpu.memory_space<vmem>>, %arg8: memref<8x128xf32, #tpu.memory_space<vmem>>) attributes {dimension_semantics = [#tpu.dimension_semantics<parallel>], iteration_bounds = array<i64: 2>, scalar_prefetch = 0 : i64, scratch_operands = 0 : i64, tpu.core_type = #tpu.core_type<tc>, window_params = [{transform_indices = @transform_0, window_bounds = array<i64: 8, 128>}, {pipeline_mode = #tpu.pipeline_mode<synchronous>, transform_indices = @transform_1, window_bounds = array<i64: 128, 128>}, {pipeline_mode = #tpu.pipeline_mode<synchronous>, transform_indices = @transform_2, window_bounds = array<i64: 128, 128>}, {pipeline_mode = #tpu.pipeline_mode<synchronous>, transform_indices = @transform_3, window_bounds = array<i64: 128, 128>}, {pipeline_mode = #tpu.pipeline_mode<synchronous>, transform_indices = @transform_4, window_bounds = array<i64: 128, 128>}, {pipeline_mode = #tpu.pipeline_mode<synchronous>, transform_indices = @transform_5, window_bounds = array<i64: 8, 128>}, {transform_indices = @transform_6, window_bounds = array<i64: 8, 128>}, {transform_indices = @transform_7, window_bounds = array<i64: 8, 128>}]} {
    %c0 = arith.constant 0 : index
    %c0_0 = arith.constant 0 : index
    %0 = vector.load %arg6[%c0, %c0_0] : memref<8x128xf32, #tpu.memory_space<vmem>>, vector<8x128xf32>
    %1 = vector.extract_strided_slice %0 {offsets = [0, 0], sizes = [1, 128], strides = [1, 1]} : vector<8x128xf32> to vector<1x128xf32>
    %2 = vector.extract_strided_slice %0 {offsets = [1, 0], sizes = [1, 128], strides = [1, 1]} : vector<8x128xf32> to vector<1x128xf32>
    %3 = vector.extract_strided_slice %0 {offsets = [2, 0], sizes = [1, 128], strides = [1, 1]} : vector<8x128xf32> to vector<1x128xf32>
    %4 = vector.extract_strided_slice %0 {offsets = [3, 0], sizes = [1, 128], strides = [1, 1]} : vector<8x128xf32> to vector<1x128xf32>
    %5 = vector.extract_strided_slice %0 {offsets = [4, 0], sizes = [1, 128], strides = [1, 1]} : vector<8x128xf32> to vector<1x128xf32>
    %6 = vector.extract_strided_slice %0 {offsets = [5, 0], sizes = [1, 128], strides = [1, 1]} : vector<8x128xf32> to vector<1x128xf32>
    %c0_1 = arith.constant 0 : index
    %c0_2 = arith.constant 0 : index
    %7 = vector.load %arg1[%c0_1, %c0_2] : memref<8x128xf32, #tpu.memory_space<vmem>>, vector<8x128xf32>
    %c0_3 = arith.constant 0 : index
    %c0_4 = arith.constant 0 : index
    %8 = vector.load %arg2[%c0_3, %c0_4] : memref<128x128xbf16, #tpu.memory_space<vmem>>, vector<128x128xbf16>
    %9 = arith.truncf %7 : vector<8x128xf32> to vector<8x128xbf16>
    %cst = arith.constant dense<0.000000e+00> : vector<8x128xf32>
    %10 = tpu.matmul %9, %8, %cst {dimension_numbers = #tpu.dot_dimension_numbers<[1], [0], [0], [1], [0, 0, 1, 1], [], []>} : vector<8x128xbf16>, vector<128x128xbf16>, vector<8x128xf32> -> vector<8x128xf32>
    %cst_5 = arith.constant dense<0.000000e+00> : vector<128xf32>
    %11 = vector.multi_reduction <add>, %10, %cst_5 [0] : vector<8x128xf32> to vector<128xf32>
    %12 = vector.shape_cast %11 : vector<128xf32> to vector<1x128xf32>
    %cst_6 = arith.constant 8.000000e+00 : f32
    %13 = vector.broadcast %cst_6 : f32 to vector<1x128xf32>
    %14 = arith.divf %12, %13 : vector<1x128xf32>
    %15 = arith.mulf %10, %10 : vector<8x128xf32>
    %cst_7 = arith.constant dense<0.000000e+00> : vector<128xf32>
    %16 = vector.multi_reduction <add>, %15, %cst_7 [0] : vector<8x128xf32> to vector<128xf32>
    %17 = vector.shape_cast %16 : vector<128xf32> to vector<1x128xf32>
    %cst_8 = arith.constant 8.000000e+00 : f32
    %18 = vector.broadcast %cst_8 : f32 to vector<1x128xf32>
    %19 = arith.divf %17, %18 : vector<1x128xf32>
    %20 = arith.mulf %14, %14 : vector<1x128xf32>
    %21 = arith.subf %19, %20 : vector<1x128xf32>
    %22 = vector.broadcast %14 : vector<1x128xf32> to vector<8x128xf32>
    %23 = arith.subf %10, %22 : vector<8x128xf32>
    %cst_9 = arith.constant 9.99999974E-6 : f32
    %24 = vector.broadcast %cst_9 : f32 to vector<1x128xf32>
    %25 = arith.addf %21, %24 : vector<1x128xf32>
    %26 = math.rsqrt %25 : vector<1x128xf32>
    %27 = vector.broadcast %26 : vector<1x128xf32> to vector<8x128xf32>
    %28 = arith.mulf %23, %27 : vector<8x128xf32>
    %29 = vector.broadcast %1 : vector<1x128xf32> to vector<8x128xf32>
    %30 = arith.mulf %28, %29 : vector<8x128xf32>
    %31 = vector.broadcast %2 : vector<1x128xf32> to vector<8x128xf32>
    %32 = arith.addf %30, %31 : vector<8x128xf32>
    %cst_10 = arith.constant 0.000000e+00 : f32
    %33 = vector.broadcast %cst_10 : f32 to vector<8x128xf32>
    %34 = arith.maximumf %32, %33 : vector<8x128xf32>
    %c0_11 = arith.constant 0 : index
    %c0_12 = arith.constant 0 : index
    %35 = vector.load %arg3[%c0_11, %c0_12] : memref<128x128xbf16, #tpu.memory_space<vmem>>, vector<128x128xbf16>
    %36 = arith.truncf %34 : vector<8x128xf32> to vector<8x128xbf16>
    %cst_13 = arith.constant dense<0.000000e+00> : vector<8x128xf32>
    %37 = tpu.matmul %36, %35, %cst_13 {dimension_numbers = #tpu.dot_dimension_numbers<[1], [0], [0], [1], [0, 0, 1, 1], [], []>} : vector<8x128xbf16>, vector<128x128xbf16>, vector<8x128xf32> -> vector<8x128xf32>
    %cst_14 = arith.constant dense<0.000000e+00> : vector<128xf32>
    %38 = vector.multi_reduction <add>, %37, %cst_14 [0] : vector<8x128xf32> to vector<128xf32>
    %39 = vector.shape_cast %38 : vector<128xf32> to vector<1x128xf32>
    %cst_15 = arith.constant 8.000000e+00 : f32
    %40 = vector.broadcast %cst_15 : f32 to vector<1x128xf32>
    %41 = arith.divf %39, %40 : vector<1x128xf32>
    %42 = arith.mulf %37, %37 : vector<8x128xf32>
    %cst_16 = arith.constant dense<0.000000e+00> : vector<128xf32>
    %43 = vector.multi_reduction <add>, %42, %cst_16 [0] : vector<8x128xf32> to vector<128xf32>
    %44 = vector.shape_cast %43 : vector<128xf32> to vector<1x128xf32>
    %cst_17 = arith.constant 8.000000e+00 : f32
    %45 = vector.broadcast %cst_17 : f32 to vector<1x128xf32>
    %46 = arith.divf %44, %45 : vector<1x128xf32>
    %47 = arith.mulf %41, %41 : vector<1x128xf32>
    %48 = arith.subf %46, %47 : vector<1x128xf32>
    %49 = vector.broadcast %41 : vector<1x128xf32> to vector<8x128xf32>
    %50 = arith.subf %37, %49 : vector<8x128xf32>
    %cst_18 = arith.constant 9.99999974E-6 : f32
    %51 = vector.broadcast %cst_18 : f32 to vector<1x128xf32>
    %52 = arith.addf %48, %51 : vector<1x128xf32>
    %53 = math.rsqrt %52 : vector<1x128xf32>
    %54 = vector.broadcast %53 : vector<1x128xf32> to vector<8x128xf32>
    %55 = arith.mulf %50, %54 : vector<8x128xf32>
    %56 = vector.broadcast %3 : vector<1x128xf32> to vector<8x128xf32>
    %57 = arith.mulf %55, %56 : vector<8x128xf32>
    %58 = vector.broadcast %4 : vector<1x128xf32> to vector<8x128xf32>
    %59 = arith.addf %57, %58 : vector<8x128xf32>
    %c0_19 = arith.constant 0 : index
    %c0_20 = arith.constant 0 : index
    %60 = vector.load %arg8[%c0_19, %c0_20] : memref<8x128xf32, #tpu.memory_space<vmem>>, vector<8x128xf32>
    tpu.vector_store %arg8[%c0_19, %c0_20], %59 {strides = array<i32>} : memref<8x128xf32, #tpu.memory_space<vmem>>, vector<8x128xf32>,
    %c0_21 = arith.constant 0 : index
    %c0_22 = arith.constant 0 : index
    %61 = vector.load %arg4[%c0_21, %c0_22] : memref<128x128xbf16, #tpu.memory_space<vmem>>, vector<128x128xbf16>
    %62 = arith.truncf %59 : vector<8x128xf32> to vector<8x128xbf16>
    %cst_23 = arith.constant dense<0.000000e+00> : vector<8x128xf32>
    %63 = tpu.matmul %62, %61, %cst_23 {dimension_numbers = #tpu.dot_dimension_numbers<[1], [0], [0], [1], [0, 0, 1, 1], [], []>} : vector<8x128xbf16>, vector<128x128xbf16>, vector<8x128xf32> -> vector<8x128xf32>
    %64 = vector.broadcast %5 : vector<1x128xf32> to vector<8x128xf32>
    %65 = arith.addf %63, %64 : vector<8x128xf32>
    %cst_24 = arith.constant 0.000000e+00 : f32
    %66 = vector.broadcast %cst_24 : f32 to vector<8x128xf32>
    %67 = arith.maximumf %65, %66 : vector<8x128xf32>
    %c0_25 = arith.constant 0 : index
    %c0_26 = arith.constant 0 : index
    %68 = vector.load %arg5[%c0_25, %c0_26] : memref<128x128xbf16, #tpu.memory_space<vmem>>, vector<128x128xbf16>
    %69 = arith.truncf %67 : vector<8x128xf32> to vector<8x128xbf16>
    %cst_27 = arith.constant dense<0.000000e+00> : vector<8x128xf32>
    %70 = tpu.matmul %69, %68, %cst_27 {dimension_numbers = #tpu.dot_dimension_numbers<[1], [0], [0], [1], [0, 0, 1, 1], [], []>} : vector<8x128xbf16>, vector<128x128xbf16>, vector<8x128xf32> -> vector<8x128xf32>
    %71 = vector.broadcast %6 : vector<1x128xf32> to vector<8x128xf32>
    %72 = arith.addf %70, %71 : vector<8x128xf32>
    %c0_28 = arith.constant 0 : index
    %c0_29 = arith.constant 0 : index
    %73 = vector.load %arg7[%c0_28, %c0_29] : memref<8x128xf32, #tpu.memory_space<vmem>>, vector<8x128xf32>
    tpu.vector_store %arg7[%c0_28, %c0_29], %72 {strides = array<i32>} : memref<8x128xf32, #tpu.memory_space<vmem>>, vector<8x128xf32>,
    return
  }
  func.func @transform_0(%arg0: i32) -> (i32, i32) {
    %c0_i32 = arith.constant 0 : i32
    %c0_i32_0 = arith.constant 0 : i32
    return %arg0, %c0_i32 : i32, i32
  }
  func.func @transform_1(%arg0: i32) -> (i32, i32) {
    %c0_i32 = arith.constant 0 : i32
    %c0_i32_0 = arith.constant 0 : i32
    %c0_i32_1 = arith.constant 0 : i32
    return %c0_i32, %c0_i32_0 : i32, i32
  }
  func.func @transform_2(%arg0: i32) -> (i32, i32) {
    %c0_i32 = arith.constant 0 : i32
    %c0_i32_0 = arith.constant 0 : i32
    %c0_i32_1 = arith.constant 0 : i32
    return %c0_i32, %c0_i32_0 : i32, i32
  }
  func.func @transform_3(%arg0: i32) -> (i32, i32) {
    %c0_i32 = arith.constant 0 : i32
    %c0_i32_0 = arith.constant 0 : i32
    %c0_i32_1 = arith.constant 0 : i32
    return %c0_i32, %c0_i32_0 : i32, i32
  }
  func.func @transform_4(%arg0: i32) -> (i32, i32) {
    %c0_i32 = arith.constant 0 : i32
    %c0_i32_0 = arith.constant 0 : i32
    %c0_i32_1 = arith.constant 0 : i32
    return %c0_i32, %c0_i32_0 : i32, i32
  }
  func.func @transform_5(%arg0: i32) -> (i32, i32) {
    %c0_i32 = arith.constant 0 : i32
    %c0_i32_0 = arith.constant 0 : i32
    %c0_i32_1 = arith.constant 0 : i32
    return %c0_i32, %c0_i32_0 : i32, i32
  }
  func.func @transform_6(%arg0: i32) -> (i32, i32) {
    %c0_i32 = arith.constant 0 : i32
    %c0_i32_0 = arith.constant 0 : i32
    return %arg0, %c0_i32 : i32, i32
  }
  func.func @transform_7(%arg0: i32) -> (i32, i32) {
    %c0_i32 = arith.constant 0 : i32
    %c0_i32_0 = arith.constant 0 : i32
    return %arg0, %c0_i32 : i32, i32
  }
}

</mosaic_0001>

<bundles_post_ra>
// kernel: autoencoder_forward.1
= control target key start
LH: loop header
LB: loop body
LE: loop exit
PB: predicated region body
PF: predicated region fallthrough
CT: control target
= control target key end

     0   :  { %13 = vsyncpa [#allocation3], 0  ;;  %s1572_s0 = inlined_call_operand.vmem [shape: f32[16,128], index: 0, kind: input, shape index: {}]   ;;  %s1573_s1 = inlined_call_operand.hbm [shape: bf16[128,128], index: 1, kind: input, shape index: {}]   ;;  %s1574_s2 = inlined_call_operand.hbm [shape: bf16[128,128], index: 2, kind: input, shape index: {}]   ;;  %s1575_s3 = inlined_call_operand.hbm [shape: bf16[128,128], index: 3, kind: input, shape index: {}]   ;;  %s1576_s4 = inlined_call_operand.hbm [shape: bf16[128,128], index: 4, kind: input, shape index: {}]   ;;  %s1577_s5 = inlined_call_operand.vmem [shape: f32[8,128], index: 5, kind: input, shape index: {}]   ;;  %s1578_s6 = inlined_call_operand.vmem [shape: f32[16,128], index: 6, kind: output, shape index: {0}]   ;;  %s1579_s7 = inlined_call_operand.vmem [shape: f32[16,128], index: 7, kind: output, shape index: {1}]  }
   0x1   :  { %14 = vsyncpa [#allocation5], 0 }
   0x2   :  { %15 = vsyncpa [#allocation8], 0  ;;  %s1394_s24 = smov 0  }
   0x3 LB: > { %s1400_s25 = sadd.s32 4294967295, %s1344_s24   ;;  %p969_p0 = scmp.ge.s32.totalorder %s1344_s24, 1  ;;  %s1344_s24 = sphi %s1394_s24, %s21_s24  }
   0x4   : > { %p209_p1 = scmp.lt.s32.totalorder %s1344_s24, 3  ;;  %p1162_p2 = scmp.eq.s32.totalorder %s1400_s25, 0 }
   0x5   : > { %s1346_s27 = smov [#allocation4]   ;;  %s1347_s29 = smov [#allocation2]  }
   0x6   : > { %p1405_p3 = pnand %p969_p0, %p209_p1  ;;  %s234_s28 = sshll.u32 %s1346_s27, 4  ;;  %s235_s28 = int_to_ptr.vmem [resolvable:$true] %s234_s28 }
   0x7   : > { %s221_s30 = sshll.u32 %s1347_s29, 4  ;;  %s1348_s9 = smov [#allocation6]   ;;  %s1411_s30 = int_to_ptr.vmem [resolvable:$true] %s221_s30 }
   0x8   : > { %p1149_p4 = pneg %p1405_p3  ;;  %s247_s10 = sshll.u32 %s1348_s9, 4  ;;  %s1419_s10 = int_to_ptr.vmem [resolvable:$true] %s247_s10 }
   0x9   : > { %s1349_s11 = smov [#allocation7]   ;;  %s1233_s13 = scalar_lea.vmem %s235_s28, 1024 }
   0xa   : > { %p1415_p5 = pnand %p1162_p2, %p1149_p4  ;;  %s1421_s12 = sshll.u32 %s1349_s11, 4  ;;  %s261_s12 = int_to_ptr.vmem [resolvable:$true] %s1421_s12 }
   0xb   : > { %p1234_p7 = scmp.ne.s32.totalorder %s235_s28, %s1233_s13  ;;  %p1241_p10 = scmp.lt.s32.totalorder %s235_s28, %s235_s28 }
   0xc   : > { %p1224_p6 = pneg %p1415_p5  ;;  %p1242_p11 = scmp.lt.s32.totalorder %s1233_s13, %s1233_s13 }
   0xe   : > { %p1236_p8 = pnand %p1234_p7, %p1224_p6  ;;  %p1243_p12 = por %p1242_p11, %p1241_p10 }
  0x10   : > { %p1237_p9 = pneg %p1236_p8 }
  0x12   : > { %p1244_p13 = pnand %p1243_p12, %p1237_p9 }
  0x14   : > { %1247 = shalt.err (!%p1244_p13)
}
  0x15   : > { %s1350_s14 = smov 64   ;;  %s1351_s15 = smov 4  }
  0x16   : > { %1155 = dma.hbm_to_vmem [thread:$0]  (!%p1415_p5), %s1574_s2, 1024, %s235_s28, [#allocation5], %s1350_s14, %s1350_s14, %s1351_s15  }
  0x17   : > { %s1259_s18 = scalar_lea.vmem %s1411_s30, 1024  ;;  %p1267_p7 = scmp.lt.s32.totalorder %s1411_s30, %s1411_s30 }
  0x18   : > { %p1260_p0 = scmp.ne.s32.totalorder %s1411_s30, %s1259_s18  ;;  %p1268_p8 = scmp.lt.s32.totalorder %s1259_s18, %s1259_s18 }
  0x1a   : > { %p1262_p1 = pnand %p1260_p0, %p1224_p6  ;;  %p1269_p9 = por %p1268_p8, %p1267_p7 }
  0x1c   : > { %p1263_p4 = pneg %p1262_p1 }
  0x1e   : > { %p1270_p10 = pnand %p1269_p9, %p1263_p4 }
  0x20   : > { %1273 = shalt.err (!%p1270_p10)
}
  0x21   : > { %1152 = dma.hbm_to_vmem [thread:$0]  (!%p1415_p5), %s1573_s1, 1024, %s1411_s30, [#allocation3], %s1350_s14, %s1350_s14, %s1351_s15  }
  0x22   : > { %s1285_s21 = scalar_lea.vmem %s1419_s10, 1024  ;;  %p1293_p0 = scmp.lt.s32.totalorder %s1419_s10, %s1419_s10 }
  0x23   : > { %p1286_p11 = scmp.ne.s32.totalorder %s1419_s10, %s1285_s21  ;;  %p1294_p1 = scmp.lt.s32.totalorder %s1285_s21, %s1285_s21 }
  0x25   : > { %p1288_p12 = pnand %p1286_p11, %p1224_p6  ;;  %p1295_p4 = por %p1294_p1, %p1293_p0 }
  0x27   : > { %p1289_p13 = pneg %p1288_p12 }
  0x29   : > { %p1296_p7 = pnand %p1295_p4, %p1289_p13 }
  0x2b   : > { %1299 = shalt.err (!%p1296_p7)
}
  0x2c   : > { %1158 = dma.hbm_to_vmem [thread:$0]  (!%p1415_p5), %s1575_s3, 1024, %s1419_s10, [#allocation5], %s1350_s14, %s1350_s14, %s1351_s15  }
  0x2d   : > { %s1311_s27 = scalar_lea.vmem %s261_s12, 1024  ;;  %p1319_p11 = scmp.lt.s32.totalorder %s261_s12, %s261_s12 }
  0x2e   : > { %p1312_p8 = scmp.ne.s32.totalorder %s261_s12, %s1311_s27  ;;  %p1320_p12 = scmp.lt.s32.totalorder %s1311_s27, %s1311_s27 }
  0x30   : > { %p1314_p9 = pnand %p1312_p8, %p1224_p6  ;;  %p1321_p13 = por %p1320_p12, %p1319_p11 }
  0x32   : > { %p1315_p10 = pneg %p1314_p9 }
  0x34   : > { %p1322_p0 = pnand %p1321_p13, %p1315_p10 }
  0x36   : > { %1325 = shalt.err (!%p1322_p0)
}
  0x37   : > { %1161 = dma.hbm_to_vmem [thread:$0]  (!%p1415_p5), %s1576_s4, 1024, %s261_s12, [#allocation8], %s1350_s14, %s1350_s14, %s1351_s15  }
  0x38   : > { %286 = sbr.rel (%p1405_p3) target bundleno = 970 (0x3ca), region = 44 }
  0x3d   : > { %1331 = dma.done.wait (%p1162_p2), [#allocation3], 1024  }
  0x3e   : > { %1333 = vsyncadd (%p1162_p2), [#allocation3], 4294966272 }
  0x3f   : > { %1335 = dma.done.wait (%p1162_p2), [#allocation5], 2048  }
  0x40   : > { %1337 = vsyncadd (%p1162_p2), [#allocation5], 4294965248 }
  0x41   : > { %1339 = dma.done.wait (%p1162_p2), [#allocation8], 1024  }
  0x42   : > { %1341 = vsyncadd (%p1162_p2), [#allocation8], 4294966272  ;;  %v1352_v0 = vmov 0.0   ;;  %vm1353_vm0 = vmmov 0   ;;  %v1186_v1 = vld [vmem:[#allocation2 + $0x38] sm:$0xff]   ;;  %p332_p3 = scmp.lt.s32.totalorder %s1400_s25, 1  ;;  %v474_v41 = vlaneseq }
  0x43   : > { %1053 = vmatprep.subr.bf16.mxu0 %v1352_v0  ;;  %1069 = vmatprep.mubr.msk.bf16.mxu0 %vm1353_vm0, %v1352_v0  ;;  %v1187_v2 = vld [vmem:[#allocation2 + $0x30] sm:$0xff]   ;;  %v1188_v3 = vld [vmem:[#allocation2 + $0x28] sm:$0xff]   ;;  %v1189_v4 = vld [vmem:[#allocation2 + $0x20] sm:$0xff]  }
  0x44   : > { %1073 = vmatprep.subr.bf16.mxu1 %v1352_v0  ;;  %1089 = vmatprep.mubr.msk.bf16.mxu1 %vm1353_vm0, %v1352_v0  ;;  %s1583_s25 = smov (!%p332_p3, %s1400_s25), 1  ;;  %v1190_v5 = vld [vmem:[#allocation2 + $0x18] sm:$0xff]   ;;  %v1191_v6 = vld [vmem:[#allocation2 + $0x10] sm:$0xff]   ;;  %v1192_v7 = vld [vmem:[#allocation2 + $0x8] sm:$0xff]   ;;  %v1526_v42 = vshrl.u32 %v474_v41, 7 }
  0x45   : > { %1054 = vmatpush3.bf16.msra.mxu0 %v1186_v1  ;;  %s1504_s26 = sshll.u32 %s1583_s25, 3  ;;  %v1193_v8 = vld [vmem:[#allocation2] sm:$0xff]   ;;  %v1194_v11 = vld [vmem:[#allocation4 + $0x38] sm:$0xff]   ;;  %v1195_v12 = vld [vmem:[#allocation4 + $0x30] sm:$0xff]  }
  0x46   : > { %1055 = vmatprep.subr.bf16.mxu0 %v1352_v0  ;;  %s335_s25 = scalar_lea.vmem %s1572_s0, %s1504_s26  ;;  %1074 = vmatpush3.bf16.msra.mxu1 %v1194_v11  ;;  %v1196_v13 = vld [vmem:[#allocation4 + $0x28] sm:$0xff]   ;;  %v1197_v14 = vld [vmem:[#allocation4 + $0x20] sm:$0xff]   ;;  %v1198_v15 = vld [vmem:[#allocation4 + $0x18] sm:$0xff]   ;;  %v476_v43 = vsub.s32 0, %v1526_v42  ;;  %v481_v45 = vsub.s32 1, %v1526_v42  ;;  %s343_s13 = scalar_lea.vmem %s1579_s7, %s1504_s26 }
  0x47   : > { %v346_v9 = vld [vmem:[%s335_s25] sm:$0xff]  ;;  %1075 = vmatprep.subr.bf16.mxu1 %v1352_v0  ;;  %v1199_v16 = vld [vmem:[#allocation4 + $0x10] sm:$0xff]   ;;  %v1200_v17 = vld [vmem:[#allocation4 + $0x8] sm:$0xff]   ;;  %s339_s16 = scalar_lea.vmem %s1578_s6, %s1504_s26 }
  0x48   : > { %v363_v10 = vpack.c.bf16 %v346_v9, %v346_v9  ;;  %v1201_v18 = vld [vmem:[#allocation4] sm:$0xff]   ;;  %v1202_v55 = vld [vmem:[#allocation6 + $0x38] sm:$0xff]   ;;  %v1203_v56 = vld [vmem:[#allocation6 + $0x30] sm:$0xff]  }
  0x49   : > { %1056 = vmatpush3.bf16.msra.mxu0 %v1187_v2  ;;  %v1532_v44 = vld [vmem:[%s1577_s5] sm:$0xff]  ;;  %v1204_v57 = vld [vmem:[#allocation6 + $0x28] sm:$0xff]   ;;  %v1206_v59 = vld [vmem:[#allocation6 + $0x18] sm:$0xff]  }
  0x4a   : > { %1057 = vmatprep.subr.bf16.mxu0 %v1352_v0  ;;  %1076 = vmatpush3.bf16.msra.mxu1 %v1195_v12  ;;  %v477_v47 = vrot.slane %v1532_v44, %v476_v43  ;;  %v482_v50 = vrot.slane %v1532_v44, %v481_v45  ;;  %v1205_v58 = vld [vmem:[#allocation6 + $0x20] sm:$0xff]   ;;  %v1207_v60 = vld [vmem:[#allocation6 + $0x10] sm:$0xff]   ;;  %v1208_v61 = vld [vmem:[#allocation6 + $0x8] sm:$0xff]  }
  0x4b   : > { %1077 = vmatprep.subr.bf16.mxu1 %v1352_v0  ;;  %v1209_v62 = vld [vmem:[#allocation6] sm:$0xff]   ;;  %v1210_v63 = vld [vmem:[#allocation7 + $0x38] sm:$0xff]   ;;  %v1211_v1 = vld [vmem:[#allocation7 + $0x30] sm:$0xff]  }
  0x4c   : > { %v1212_v2 = vld [vmem:[#allocation7 + $0x28] sm:$0xff]  }
  0x4d   : > { %1058 = vmatpush3.bf16.msra.mxu0 %v1188_v3  ;;  %v1213_v3 = vld [vmem:[#allocation7 + $0x20] sm:$0xff]  }
  0x4e   : > { %1059 = vmatprep.subr.bf16.mxu0 %v1352_v0  ;;  %1078 = vmatpush3.bf16.msra.mxu1 %v1196_v13 }
  0x4f   : > { %1079 = vmatprep.subr.bf16.mxu1 %v1352_v0 }
  0x51   : > { %1060 = vmatpush3.bf16.msra.mxu0 %v1189_v4  ;;  %v1214_v4 = vld [vmem:[#allocation7 + $0x18] sm:$0xff]  }
  0x52   : > { %1061 = vmatprep.subr.bf16.mxu0 %v1352_v0  ;;  %1080 = vmatpush3.bf16.msra.mxu1 %v1197_v14 }
  0x53   : > { %1081 = vmatprep.subr.bf16.mxu1 %v1352_v0 }
  0x55   : > { %1062 = vmatpush3.bf16.msra.mxu0 %v1190_v5  ;;  %v1215_v5 = vld [vmem:[#allocation7 + $0x10] sm:$0xff]  }
  0x56   : > { %1063 = vmatprep.subr.bf16.mxu0 %v1352_v0  ;;  %1082 = vmatpush3.bf16.msra.mxu1 %v1198_v15 }
  0x57   : > { %1083 = vmatprep.subr.bf16.mxu1 %v1352_v0 }
  0x59   : > { %1064 = vmatpush3.bf16.msra.mxu0 %v1191_v6 }
  0x5a   : > { %1065 = vmatprep.subr.bf16.mxu0 %v1352_v0  ;;  %1084 = vmatpush3.bf16.msra.mxu1 %v1199_v16 }
  0x5b   : > { %1085 = vmatprep.subr.bf16.mxu1 %v1352_v0 }
  0x5d   : > { %1066 = vmatpush3.bf16.msra.mxu0 %v1192_v7 }
  0x5e   : > { %1067 = vmatprep.subr.bf16.mxu0 %v1352_v0  ;;  %1086 = vmatpush3.bf16.msra.mxu1 %v1200_v17 }
  0x5f   : > { %1087 = vmatprep.subr.bf16.mxu1 %v1352_v0 }
  0x61   : > { %1068 = vmatpush3.bf16.msra.mxu0 %v1193_v8 }
  0x62   : > { %1093 = vmatprep.subr.bf16.mxu0 %v1352_v0  ;;  %1088 = vmatpush3.bf16.msra.mxu1 %v1201_v18 }
  0x63   : > { %1113 = vmatprep.subr.bf16.mxu1 %v1352_v0 }
  0x64   : > { %1070 = vmatmul.mubr.bf16.vlgmr.msra.gmra.mxu0 %v363_v10 }
  0x65   : > { %1109 = vmatprep.mubr.msk.bf16.mxu0 %vm1353_vm0, %v1352_v0  ;;  %1094 = vmatpush3.bf16.msra.mxu0 %v1202_v55 }
  0x66   : > { %1095 = vmatprep.subr.bf16.mxu0 %v1352_v0 }
  0x69   : > { %1096 = vmatpush3.bf16.msra.mxu0 %v1203_v56 }
  0x6a   : > { %1097 = vmatprep.subr.bf16.mxu0 %v1352_v0 }
  0x6d   : > { %1098 = vmatpush3.bf16.msra.mxu0 %v1204_v57 }
  0x6e   : > { %1099 = vmatprep.subr.bf16.mxu0 %v1352_v0 }
  0x71   : > { %1100 = vmatpush3.bf16.msra.mxu0 %v1205_v58 }
  0x72   : > { %1101 = vmatprep.subr.bf16.mxu0 %v1352_v0 }
  0x75   : > { %1102 = vmatpush3.bf16.msra.mxu0 %v1206_v59 }
  0x76   : > { %1103 = vmatprep.subr.bf16.mxu0 %v1352_v0 }
  0x79   : > { %1104 = vmatpush3.bf16.msra.mxu0 %v1207_v60 }
  0x7a   : > { %1105 = vmatprep.subr.bf16.mxu0 %v1352_v0 }
  0x7d   : > { %1106 = vmatpush3.bf16.msra.mxu0 %v1208_v61 }
  0x7e   : > { %1107 = vmatprep.subr.bf16.mxu0 %v1352_v0 }
  0x81   : > { %1108 = vmatpush3.bf16.msra.mxu0 %v1209_v62 }
 0x124   : > { %v446_v19 = vpop.f32.mrf.mxu0 }
 0x125   : > { %v452_v20 = vrot.slane %v446_v19, 4  ;;  %v460_v21 = vmul.f32 %v446_v19, %v446_v19 }
 0x126   : > { %v1071_v22 = vpop.f32.mrf.mxu0 }
 0x127   : > { %v453_v23 = vadd.f32 %v452_v20, %v446_v19  ;;  %v461_v24 = vrot.slane %v460_v21, 4 }
 0x128   : > { %v449_v25 = vpop.f32.mrf.mxu0 }
 0x129   : > { %v454_v26 = vrot.slane %v453_v23, 2  ;;  %v462_v27 = vadd.f32 %v461_v24, %v460_v21 }
 0x12a   : > { %v1072_v28 = vpop.f32.mrf.mxu0 }
 0x12b   : > { %v455_v29 = vadd.f32 %v454_v26, %v453_v23  ;;  %v463_v30 = vrot.slane %v462_v27, 2  ;;  %v613_v28 = vsub.s32 2, %v1526_v42 }
 0x12d   : > { %v456_v31 = vrot.slane %v455_v29, 1  ;;  %v464_v32 = vadd.f32 %v463_v30, %v462_v27 }
 0x12f   : > { %v457_v33 = vadd.f32 %v456_v31, %v455_v29  ;;  %v465_v34 = vrot.slane %v464_v32, 1  ;;  %v618_v29 = vsub.s32 3, %v1526_v42  ;;  %v614_v31 = vrot.slane %v1532_v44, %v613_v28 }
 0x131   : > { %v459_v35 = vmul.f32 0.125, %v457_v33  ;;  %v466_v36 = vadd.f32 %v465_v34, %v464_v32  ;;  %v619_v34 = vrot.slane %v1532_v44, %v618_v29 }
 0x133   : > { %v467_v37 = vmul.f32 0.125, %v466_v36  ;;  %v468_v38 = vmul.f32 %v459_v35, %v459_v35  ;;  %v470_v46 = vsub.f32 %v446_v19, %v459_v35 }
 0x135   : > { %v469_v39 = vsub.f32 %v467_v37, %v468_v38  ;;  %v1216_v38 = vld [vmem:[#allocation7 + $0x8] sm:$0xff]  }
 0x137   : > { %v471_v40 = vadd.f32 1e-05, %v469_v39  ;;  %v1217_v39 = vld [vmem:[#allocation7] sm:$0xff]  }
 0x139   : > { %1218 = vrsqrt.f32 %v471_v40  ;;  %v641_v40 = vsub.s32 4, %v1526_v42 }
 0x13b   : > { %v642_v41 = vrot.slane %v1532_v44, %v641_v40 }
 0x146   : > { %v1219_v48 = vpop.eup %1218 }
 0x147   : > { %v473_v49 = vmul.f32 %v1219_v48, %v470_v46 }
 0x149   : > { %v478_v51 = vmul.f32 %v477_v47, %v473_v49 }
 0x14b   : > { %v483_v52 = vadd.f32 %v482_v50, %v478_v51  ;;  %v751_v51 = vsub.s32 5, %v1526_v42 }
 0x14d   : > { %v484_v53 = vmax.f32 %v483_v52, 0.0  ;;  %v752_v52 = vrot.slane %v1532_v44, %v751_v51 }
 0x14f   : > { %v501_v54 = vpack.c.bf16 %v484_v53, %v484_v53 }
 0x151   : > { %1090 = vmatmul.mubr.bf16.vlgmr.msra.gmra.mxu1 %v501_v54 }
 0x152   : > { %1129 = vmatprep.mubr.msk.bf16.mxu1 %vm1353_vm0, %v1352_v0  ;;  %1114 = vmatpush3.bf16.msra.mxu1 %v1210_v63 }
 0x153   : > { %1115 = vmatprep.subr.bf16.mxu1 %v1352_v0 }
 0x156   : > { %1116 = vmatpush3.bf16.msra.mxu1 %v1211_v1 }
 0x157   : > { %1117 = vmatprep.subr.bf16.mxu1 %v1352_v0 }
 0x15a   : > { %1118 = vmatpush3.bf16.msra.mxu1 %v1212_v2 }
 0x15b   : > { %1119 = vmatprep.subr.bf16.mxu1 %v1352_v0 }
 0x15e   : > { %1120 = vmatpush3.bf16.msra.mxu1 %v1213_v3 }
 0x15f   : > { %1121 = vmatprep.subr.bf16.mxu1 %v1352_v0 }
 0x162   : > { %1122 = vmatpush3.bf16.msra.mxu1 %v1214_v4 }
 0x163   : > { %1123 = vmatprep.subr.bf16.mxu1 %v1352_v0 }
 0x166   : > { %1124 = vmatpush3.bf16.msra.mxu1 %v1215_v5 }
 0x167   : > { %1125 = vmatprep.subr.bf16.mxu1 %v1352_v0 }
 0x16a   : > { %1126 = vmatpush3.bf16.msra.mxu1 %v1216_v38 }
 0x16b   : > { %1127 = vmatprep.subr.bf16.mxu1 %v1352_v0 }
 0x16e   : > { %1128 = vmatpush3.bf16.msra.mxu1 %v1217_v39 }
 0x211   : > { %v584_v6 = vpop.f32.mrf.mxu1 }
 0x212   : > { %v590_v7 = vrot.slane %v584_v6, 4  ;;  %v597_v8 = vmul.f32 %v584_v6, %v584_v6 }
 0x213   : > { %v1091_v9 = vpop.f32.mrf.mxu1 }
 0x214   : > { %v591_v10 = vadd.f32 %v590_v7, %v584_v6  ;;  %v598_v11 = vrot.slane %v597_v8, 4 }
 0x215   : > { %v587_v12 = vpop.f32.mrf.mxu1 }
 0x216   : > { %v592_v13 = vrot.slane %v591_v10, 2  ;;  %v599_v14 = vadd.f32 %v598_v11, %v597_v8 }
 0x217   : > { %v1092_v15 = vpop.f32.mrf.mxu1 }
 0x218   : > { %v593_v16 = vadd.f32 %v592_v13, %v591_v10  ;;  %v600_v17 = vrot.slane %v599_v14, 2 }
 0x21a   : > { %v594_v18 = vrot.slane %v593_v16, 1  ;;  %v601_v19 = vadd.f32 %v600_v17, %v599_v14 }
 0x21c   : > { %v595_v20 = vadd.f32 %v594_v18, %v593_v16  ;;  %v602_v21 = vrot.slane %v601_v19, 1 }
 0x21e   : > { %v596_v22 = vmul.f32 0.125, %v595_v20  ;;  %v603_v23 = vadd.f32 %v602_v21, %v601_v19 }
 0x220   : > { %v604_v24 = vmul.f32 0.125, %v603_v23  ;;  %v605_v25 = vmul.f32 %v596_v22, %v596_v22  ;;  %v607_v30 = vsub.f32 %v584_v6, %v596_v22 }
 0x222   : > { %v606_v26 = vsub.f32 %v604_v24, %v605_v25 }
 0x224   : > { %v608_v27 = vadd.f32 1e-05, %v606_v26 }
 0x226   : > { %1220 = vrsqrt.f32 %v608_v27 }
 0x233   : > { %v1221_v32 = vpop.eup %1220 }
 0x234   : > { %v610_v33 = vmul.f32 %v1221_v32, %v607_v30 }
 0x236   : > { %v615_v35 = vmul.f32 %v614_v31, %v610_v33 }
 0x238   : > { %v620_v36 = vadd.f32 %v619_v34, %v615_v35 }
 0x23a   : > { %621 = vst [vmem:[%s343_s13] sm:$0xff] %v620_v36  ;;  %v638_v37 = vpack.c.bf16 %v620_v36, %v620_v36 }
 0x23c   : > { %1110 = vmatmul.mubr.bf16.vlgmr.msra.gmra.mxu0 %v638_v37 }
 0x2fc   : > { %v725_v43 = vpop.f32.mrf.mxu0 }
 0x2fd   : > { %v726_v45 = vadd.f32 %v725_v43, %v642_v41 }
 0x2fe   : > { %v1111_v46 = vpop.f32.mrf.mxu0 }
 0x2ff   : > { %v731_v47 = vmax.f32 %v726_v45, 0.0 }
 0x300   : > { %v728_v48 = vpop.f32.mrf.mxu0 }
 0x301   : > { %v748_v49 = vpack.c.bf16 %v731_v47, %v731_v47 }
 0x302   : > { %v1112_v50 = vpop.f32.mrf.mxu0 }
 0x303   : > { %1130 = vmatmul.mubr.bf16.vlgmr.msra.gmra.mxu1 %v748_v49 }
 0x3c3   : > { %v835_v0 = vpop.f32.mrf.mxu1 }
 0x3c4   : > { %v836_v53 = vadd.f32 %v835_v0, %v752_v52 }
 0x3c5   : > { %v1131_v54 = vpop.f32.mrf.mxu1 }
 0x3c6   : > { %841 = vst [vmem:[%s339_s16] sm:$0xff] %v836_v53 }
 0x3c7   : > { %v838_v55 = vpop.f32.mrf.mxu1 }
 0x3c9   : > { %v1132_v56 = vpop.f32.mrf.mxu1 }
 0x3ca PF: > { %s21_s24 = sadd.s32 1, %s1344_s24  }
 0x3cb   : > { %p18_p2 = scmp.ge.s32.totalorder %s21_s24, 4  }
 0x3cd   :  { %20 = sbr.rel (!%p18_p2) target bundleno = 3 (0x3), region = 103 }
 0x3d2   :  { %875 = vsyncpa [#allocation3], 1 }
 0x3d3   :  { %877 = vsyncpa [#allocation3 + $0x1], 1 }
 0x3d4   :  { %878 = vsyncpa [#allocation5], 1 }
 0x3d5   :  { %879 = vsyncpa [#allocation8], 1 }

</bundles_post_ra>
